<compile_context>
chip_gen: v6e
topology: v6e:2x2x1
jax: 0.10.0
libtpu: 0.0.40
codegen_flags: <defaults>
</compile_context>

<pallas_src>
import numpy as np
import jax
import jax.numpy as jnp
from jax import lax
from jax.experimental import pallas as pl
from jax.experimental.pallas import tpu as pltpu


# ----------------------------------------------------------------------------
# Pallas kernel: fused interpolate + project + pos-embed, whole batch per step
# ----------------------------------------------------------------------------
def _make_fused_kernel(B, C):
    def _fused_kernel(x_ref, mt_ref, w_ref, pb_ref, o_ref):
        # x_ref:  (B*C, S)     channel-major flattened input volume (VMEM)
        # mt_ref: (S, N)       combined trilinear interp matrix, transposed (VMEM)
        # w_ref:  (C, Dout)    nn.Linear weight, transposed (VMEM)
        # pb_ref: (N, Dout)    pos_embedding + bias (VMEM)
        # o_ref:  (B, N, Dout) output (VMEM)
        mt = mt_ref[...]
        w = w_ref[...]
        pb = pb_ref[...]

        # Interpolation for the WHOLE batch in one MXU matmul:
        #   (B*C, S) @ (S, N) -> (B*C, N)   (contract the large source axis first)
        t = jnp.dot(x_ref[...], mt, preferred_element_type=jnp.float32)

        # Projection per batch element (B is tiny -> static unroll). Transposed-LHS
        # feed avoids any transpose of the activation:  t_b^T @ W : (N, C)@(C, Dout).
        for b in range(B):
            t_b = t[b * C:(b + 1) * C, :]                    # (C, N), static slice
            y = lax.dot_general(t_b, w, (((0,), (0,)), ((), ())),
                                preferred_element_type=jnp.float32)   # (N, Dout)
            o_ref[b] = (y + pb).astype(o_ref.dtype)

    return _fused_kernel


# ----------------------------------------------------------------------------
# Static interpolation matrices (align_corners=True semantics)
# ----------------------------------------------------------------------------
def _interp_matrix_np(n_out, n_in):
    """Dense (n_out, n_in) linear-interp matrix, align_corners=True."""
    if n_out == 1:
        pos = np.zeros((1,), dtype=np.float64)
    else:
        pos = np.arange(n_out, dtype=np.float64) * (n_in - 1) / (n_out - 1)
    i0 = np.clip(np.floor(pos).astype(np.int64), 0, n_in - 1)
    i1 = np.clip(i0 + 1, 0, n_in - 1)
    w = pos - i0
    A = np.zeros((n_out, n_in), dtype=np.float64)
    A[np.arange(n_out), i0] += 1.0 - w
    A[np.arange(n_out), i1] += w
    return A


def _combined_interp_matrix_T(in_shape, out_shape, dtype=jnp.float32):
    """M^T of shape (S, N) with M = kron(AH, AW, AD); row-major flattening
    matches PyTorch .view() on both source and target volumes."""
    Hi, Wi, Di = in_shape
    Ho, Wo, Do = out_shape
    AH = _interp_matrix_np(Ho, Hi)
    AW = _interp_matrix_np(Wo, Wi)
    AD = _interp_matrix_np(Do, Di)
    M = np.kron(np.kron(AH, AW), AD)          # (N, S)
    return jnp.asarray(M.T, dtype=dtype)      # (S, N)


# ----------------------------------------------------------------------------
# Full module forward (wrapper)
# ----------------------------------------------------------------------------
def interpolate_and_project(x, target_shape, weight, bias, pos_embedding):
    """
    x:             (B, C, Hi, Wi, Di)  float32
    weight:        (output_dim, input_dim)   -- PyTorch nn.Linear convention
    bias:          (output_dim,)
    pos_embedding: (N, output_dim),  N = prod(target_shape)
    returns:       (B, N, output_dim)
    """
    B, C, Hi, Wi, Di = x.shape
    Ho, Wo, Do = target_shape
    S = Hi * Wi * Di
    N = Ho * Wo * Do
    Dout = weight.shape[0]

    x_flat = x.reshape(B * C, S)                             # contiguous, free
    mt = _combined_interp_matrix_T((Hi, Wi, Di), target_shape)   # (S, N), static
    w_cd = jnp.transpose(weight, (1, 0))                     # (C, Dout)
    pos_plus_bias = pos_embedding + bias[None, :]             # bias folded, (N, Dout)

    cost = pl.CostEstimate(
        flops=2 * B * C * S * N + 2 * B * N * C * Dout,
        transcendentals=0,
        bytes_accessed=4 * (B * C * S + S * N + C * Dout + N * Dout + B * N * Dout),
    )

    return pl.pallas_call(
        _make_fused_kernel(B, C),
        out_shape=jax.ShapeDtypeStruct((B, N, Dout), jnp.float32),
        grid_spec=pltpu.PrefetchScalarGridSpec(
            num_scalar_prefetch=0,
            grid=(1,),                                        # single step: whole batch
            in_specs=[
                pl.BlockSpec((B * C, S), lambda i: (0, 0)),
                pl.BlockSpec((S, N), lambda i: (0, 0)),
                pl.BlockSpec((C, Dout), lambda i: (0, 0)),
                pl.BlockSpec((N, Dout), lambda i: (0, 0)),
            ],
            out_specs=pl.BlockSpec((B, N, Dout), lambda i: (0, 0, 0)),
        ),
        compiler_params=pltpu.CompilerParams(
            dimension_semantics=("arbitrary",)),
        cost_estimate=cost,
    )(x_flat, mt, w_cd, pos_plus_bias)


# ----------------------------------------------------------------------------
# Pure-JAX reference (independent: separable interpolation + explicit linear)
# ----------------------------------------------------------------------------
def _reference(x, target_shape, weight, bias, pos_embedding):
    B, C, Hi, Wi, Di = x.shape
    Ho, Wo, Do = target_shape
    AH = jnp.asarray(_interp_matrix_np(Ho, Hi), jnp.float32)
    AW = jnp.asarray(_interp_matrix_np(Wo, Wi), jnp.float32)
    AD = jnp.asarray(_interp_matrix_np(Do, Di), jnp.float32)
    xi = jnp.einsum("bcijk,hi,wj,dk->bchwd", x, AH, AW, AD,
                    preferred_element_type=jnp.float32)
    x_bnc = jnp.transpose(xi.reshape(B, C, Ho * Wo * Do), (0, 2, 1))
    return x_bnc @ weight.T + bias[None, None, :] + pos_embedding[None, :, :]


# ----------------------------------------------------------------------------
# Main
# ----------------------------------------------------------------------------
if __name__ == "__main__":
    key = jax.random.PRNGKey(0)
    k_x, k_w, k_b, k_p = jax.random.split(key, 4)

    # Module config (small, consistent with the forward semantics)
    B, C = 2, 4                       # batch, input channels (= input_dim)
    Hi, Wi, Di = 8, 8, 8              # input spatial dims
    target_shape = (4, 4, 4)          # interpolation target
    input_dim, output_dim = C, 32
    N = target_shape[0] * target_shape[1] * target_shape[2]   # 64

    x = jax.random.normal(k_x, (B, C, Hi, Wi, Di), dtype=jnp.float32)

    # Deterministic synthetic parameters (the module zero-inits the pos embedding;
    # small random values exercise the addition non-trivially).
    weight = 0.05 * jax.random.normal(k_w, (output_dim, input_dim), dtype=jnp.float32)
    bias = 0.05 * jax.random.normal(k_b, (output_dim,), dtype=jnp.float32)
    pos_embedding = 0.05 * jax.random.normal(k_p, (N, output_dim), dtype=jnp.float32)

    out = interpolate_and_project(x, target_shape, weight, bias, pos_embedding)
    out = jax.block_until_ready(out)

    # Correctness check against the independent pure-JAX reference
    ref = _reference(x, target_shape, weight, bias, pos_embedding)
    np.testing.assert_allclose(np.asarray(out), np.asarray(ref), rtol=1e-5, atol=1e-5)

    assert out.shape == (B, N, output_dim)
    print("KERNEL_OK")
</pallas_src>

<mosaic_0001>
module attributes {stable_mosaic.version = 11 : i64} {
  func.func @_fused_kernel(%arg0: i32, %arg1: memref<8x512xf32, #tpu.memory_space<vmem>>, %arg2: memref<512x64xf32, #tpu.memory_space<vmem>>, %arg3: memref<4x32xf32, #tpu.memory_space<vmem>>, %arg4: memref<64x32xf32, #tpu.memory_space<vmem>>, %arg5: memref<2x64x32xf32, #tpu.memory_space<vmem>>) attributes {dimension_semantics = [#tpu.dimension_semantics<arbitrary>], iteration_bounds = array<i64: 1>, scalar_prefetch = 0 : i64, scratch_operands = 0 : i64, tpu.core_type = #tpu.core_type<tc>, window_params = [{pipeline_mode = #tpu.pipeline_mode<synchronous>, transform_indices = @transform_0, window_bounds = array<i64: 8, 512>}, {pipeline_mode = #tpu.pipeline_mode<synchronous>, transform_indices = @transform_1, window_bounds = array<i64: 512, 64>}, {pipeline_mode = #tpu.pipeline_mode<synchronous>, transform_indices = @transform_2, window_bounds = array<i64: 4, 32>}, {pipeline_mode = #tpu.pipeline_mode<synchronous>, transform_indices = @transform_3, window_bounds = array<i64: 64, 32>}, {pipeline_mode = #tpu.pipeline_mode<synchronous>, transform_indices = @transform_4, window_bounds = array<i64: 2, 64, 32>}]} {
    %c0 = arith.constant 0 : index
    %c0_0 = arith.constant 0 : index
    %0 = vector.load %arg2[%c0, %c0_0] : memref<512x64xf32, #tpu.memory_space<vmem>>, vector<512x64xf32>
    %c0_1 = arith.constant 0 : index
    %c0_2 = arith.constant 0 : index
    %1 = vector.load %arg3[%c0_1, %c0_2] : memref<4x32xf32, #tpu.memory_space<vmem>>, vector<4x32xf32>
    %c0_3 = arith.constant 0 : index
    %c0_4 = arith.constant 0 : index
    %2 = vector.load %arg4[%c0_3, %c0_4] : memref<64x32xf32, #tpu.memory_space<vmem>>, vector<64x32xf32>
    %c0_5 = arith.constant 0 : index
    %c0_6 = arith.constant 0 : index
    %3 = vector.load %arg1[%c0_5, %c0_6] : memref<8x512xf32, #tpu.memory_space<vmem>>, vector<8x512xf32>
    %cst = arith.constant dense<0.000000e+00> : vector<8x64xf32>
    %4 = tpu.matmul %3, %0, %cst {dimension_numbers = #tpu.dot_dimension_numbers<[1], [0], [0], [1], [0, 0, 1, 1], [], []>} : vector<8x512xf32>, vector<512x64xf32>, vector<8x64xf32> -> vector<8x64xf32>
    %5 = vector.extract_strided_slice %4 {offsets = [0, 0], sizes = [4, 64], strides = [1, 1]} : vector<8x64xf32> to vector<4x64xf32>
    %cst_7 = arith.constant dense<0.000000e+00> : vector<64x32xf32>
    %6 = tpu.matmul %5, %1, %cst_7 {dimension_numbers = #tpu.dot_dimension_numbers<[0], [0], [1], [1], [0, 1, 1, 1], [], []>} : vector<4x64xf32>, vector<4x32xf32>, vector<64x32xf32> -> vector<64x32xf32>
    %7 = arith.addf %6, %2 : vector<64x32xf32>
    %c0_8 = arith.constant 0 : index
    %c0_9 = arith.constant 0 : index
    %c0_10 = arith.constant 0 : index
    %8 = vector.load %arg5[%c0_8, %c0_9, %c0_10] : memref<2x64x32xf32, #tpu.memory_space<vmem>>, vector<1x64x32xf32>
    %9 = vector.shape_cast %8 : vector<1x64x32xf32> to vector<64x32xf32>
    %10 = vector.shape_cast %7 : vector<64x32xf32> to vector<1x64x32xf32>
    tpu.vector_store %arg5[%c0_8, %c0_9, %c0_10], %10 {strides = array<i32>} : memref<2x64x32xf32, #tpu.memory_space<vmem>>, vector<1x64x32xf32>,
    %11 = vector.extract_strided_slice %4 {offsets = [4, 0], sizes = [4, 64], strides = [1, 1]} : vector<8x64xf32> to vector<4x64xf32>
    %cst_11 = arith.constant dense<0.000000e+00> : vector<64x32xf32>
    %12 = tpu.matmul %11, %1, %cst_11 {dimension_numbers = #tpu.dot_dimension_numbers<[0], [0], [1], [1], [0, 1, 1, 1], [], []>} : vector<4x64xf32>, vector<4x32xf32>, vector<64x32xf32> -> vector<64x32xf32>
    %13 = arith.addf %12, %2 : vector<64x32xf32>
    %c1 = arith.constant 1 : index
    %c0_12 = arith.constant 0 : index
    %c0_13 = arith.constant 0 : index
    %14 = vector.load %arg5[%c1, %c0_12, %c0_13] : memref<2x64x32xf32, #tpu.memory_space<vmem>>, vector<1x64x32xf32>
    %15 = vector.shape_cast %14 : vector<1x64x32xf32> to vector<64x32xf32>
    %16 = vector.shape_cast %13 : vector<64x32xf32> to vector<1x64x32xf32>
    tpu.vector_store %arg5[%c1, %c0_12, %c0_13], %16 {strides = array<i32>} : memref<2x64x32xf32, #tpu.memory_space<vmem>>, vector<1x64x32xf32>,
    return
  }
  func.func @transform_0(%arg0: i32) -> (i32, i32) {
    %c0_i32 = arith.constant 0 : i32
    %c0_i32_0 = arith.constant 0 : i32
    %c0_i32_1 = arith.constant 0 : i32
    return %c0_i32, %c0_i32_0 : i32, i32
  }
  func.func @transform_1(%arg0: i32) -> (i32, i32) {
    %c0_i32 = arith.constant 0 : i32
    %c0_i32_0 = arith.constant 0 : i32
    %c0_i32_1 = arith.constant 0 : i32
    return %c0_i32, %c0_i32_0 : i32, i32
  }
  func.func @transform_2(%arg0: i32) -> (i32, i32) {
    %c0_i32 = arith.constant 0 : i32
    %c0_i32_0 = arith.constant 0 : i32
    %c0_i32_1 = arith.constant 0 : i32
    return %c0_i32, %c0_i32_0 : i32, i32
  }
  func.func @transform_3(%arg0: i32) -> (i32, i32) {
    %c0_i32 = arith.constant 0 : i32
    %c0_i32_0 = arith.constant 0 : i32
    %c0_i32_1 = arith.constant 0 : i32
    return %c0_i32, %c0_i32_0 : i32, i32
  }
  func.func @transform_4(%arg0: i32) -> (i32, i32, i32) {
    %c0_i32 = arith.constant 0 : i32
    %c0_i32_0 = arith.constant 0 : i32
    %c0_i32_1 = arith.constant 0 : i32
    %c0_i32_2 = arith.constant 0 : i32
    return %c0_i32, %c0_i32_0, %c0_i32_1 : i32, i32, i32
  }
}

</mosaic_0001>

<bundles_post_ra>
// kernel: tpu_custom_call.1
= control target key start
LH: loop header
LB: loop body
LE: loop exit
PB: predicated region body
PF: predicated region fallthrough
CT: control target
= control target key end

     0   :  { %vm291_vm0 = vcmask 1043456   ;;  %vm266_vm1 = vcmask 31744   ;;  %vm400_vm2 = vcmask 261120   ;;  %s1065_s1 = inlined_call_operand.vmem [shape: f32[512,64], index: 1, kind: input, shape index: {}]   ;;  %s1066_s0 = inlined_call_operand.vmem [shape: f32[8,512], index: 0, kind: input, shape index: {}]   ;;  %s1067_s2 = inlined_call_operand.vmem [shape: f32[4,32], index: 2, kind: input, shape index: {}]   ;;  %s1068_s3 = inlined_call_operand.vmem [shape: f32[64,32], index: 3, kind: input, shape index: {}]   ;;  %s1069_s4 = inlined_call_operand.vmem [shape: f32[2,64,32], index: 4, kind: output, shape index: {}]  }
   0x1   :  { %v48_v0 = vld [vmem:[%s1065_s1 + $0xf8] sm:$0xff]  ;;  %v47_v4 = vld [vmem:[%s1065_s1 + $0xf0] sm:$0xff]  ;;  %v46_v8 = vld [vmem:[%s1065_s1 + $0xe8] sm:$0xff] }
   0x2   :  { %v80_v1 = vld [vmem:[%s1065_s1 + $0x1f8] sm:$0xff]  ;;  %612 = vmatprep.subr.mxu0 %v48_v0  ;;  %v79_v5 = vld [vmem:[%s1065_s1 + $0x1f0] sm:$0xff]  ;;  %v78_v9 = vld [vmem:[%s1065_s1 + $0x1e8] sm:$0xff] }
   0x3   :  { %v32_v2 = vld [vmem:[%s1065_s1 + $0x78] sm:$0xff]  ;;  %647 = vmatprep.subr.mxu1 %v80_v1  ;;  %v31_v6 = vld [vmem:[%s1065_s1 + $0x70] sm:$0xff]  ;;  %v30_v10 = vld [vmem:[%s1065_s1 + $0x68] sm:$0xff] }
   0x4   :  { %v64_v3 = vld [vmem:[%s1065_s1 + $0x178] sm:$0xff]  ;;  %613 = vmatpush3.msra.mxu0 %v32_v2  ;;  %v63_v7 = vld [vmem:[%s1065_s1 + $0x170] sm:$0xff]  ;;  %v62_v11 = vld [vmem:[%s1065_s1 + $0x168] sm:$0xff] }
   0x5   :  { %648 = vmatpush3.msra.mxu1 %v64_v3  ;;  %614 = vmatprep.subr.mxu0 %v47_v4  ;;  %v45_v12 = vld [vmem:[%s1065_s1 + $0xe0] sm:$0xff]  ;;  %v44_v16 = vld [vmem:[%s1065_s1 + $0xd8] sm:$0xff]  ;;  %v43_v20 = vld [vmem:[%s1065_s1 + $0xd0] sm:$0xff] }
   0x6   :  { %649 = vmatprep.subr.mxu1 %v79_v5  ;;  %615 = vmatpush3.msra.mxu0 %v31_v6  ;;  %v77_v13 = vld [vmem:[%s1065_s1 + $0x1e0] sm:$0xff]  ;;  %v76_v17 = vld [vmem:[%s1065_s1 + $0x1d8] sm:$0xff]  ;;  %v75_v21 = vld [vmem:[%s1065_s1 + $0x1d0] sm:$0xff] }
   0x7   :  { %650 = vmatpush3.msra.mxu1 %v63_v7  ;;  %616 = vmatprep.subr.mxu0 %v46_v8  ;;  %v29_v14 = vld [vmem:[%s1065_s1 + $0x60] sm:$0xff]  ;;  %v28_v18 = vld [vmem:[%s1065_s1 + $0x58] sm:$0xff]  ;;  %v27_v22 = vld [vmem:[%s1065_s1 + $0x50] sm:$0xff] }
   0x8   :  { %651 = vmatprep.subr.mxu1 %v78_v9  ;;  %v61_v15 = vld [vmem:[%s1065_s1 + $0x160] sm:$0xff]  ;;  %617 = vmatpush3.msra.mxu0 %v30_v10  ;;  %v60_v19 = vld [vmem:[%s1065_s1 + $0x158] sm:$0xff]  ;;  %v59_v23 = vld [vmem:[%s1065_s1 + $0x150] sm:$0xff] }
   0x9   :  { %652 = vmatpush3.msra.mxu1 %v62_v11  ;;  %618 = vmatprep.subr.mxu0 %v45_v12  ;;  %v42_v24 = vld [vmem:[%s1065_s1 + $0xc8] sm:$0xff]  ;;  %v41_v28 = vld [vmem:[%s1065_s1 + $0xc0] sm:$0xff]  ;;  %v40_v32 = vld [vmem:[%s1065_s1 + $0xb8] sm:$0xff] }
   0xa   :  { %653 = vmatprep.subr.mxu1 %v77_v13  ;;  %619 = vmatpush3.msra.mxu0 %v29_v14  ;;  %v74_v25 = vld [vmem:[%s1065_s1 + $0x1c8] sm:$0xff]  ;;  %v73_v29 = vld [vmem:[%s1065_s1 + $0x1c0] sm:$0xff]  ;;  %v72_v33 = vld [vmem:[%s1065_s1 + $0x1b8] sm:$0xff] }
   0xb   :  { %654 = vmatpush3.msra.mxu1 %v61_v15  ;;  %620 = vmatprep.subr.mxu0 %v44_v16  ;;  %v26_v26 = vld [vmem:[%s1065_s1 + $0x48] sm:$0xff]  ;;  %v25_v30 = vld [vmem:[%s1065_s1 + $0x40] sm:$0xff]  ;;  %v24_v34 = vld [vmem:[%s1065_s1 + $0x38] sm:$0xff] }
   0xc   :  { %655 = vmatprep.subr.mxu1 %v76_v17  ;;  %621 = vmatpush3.msra.mxu0 %v28_v18  ;;  %v58_v27 = vld [vmem:[%s1065_s1 + $0x148] sm:$0xff]  ;;  %v57_v31 = vld [vmem:[%s1065_s1 + $0x140] sm:$0xff]  ;;  %v56_v35 = vld [vmem:[%s1065_s1 + $0x138] sm:$0xff] }
   0xd   :  { %656 = vmatpush3.msra.mxu1 %v60_v19  ;;  %622 = vmatprep.subr.mxu0 %v43_v20  ;;  %v39_v36 = vld [vmem:[%s1065_s1 + $0xb0] sm:$0xff]  ;;  %v38_v40 = vld [vmem:[%s1065_s1 + $0xa8] sm:$0xff]  ;;  %v37_v44 = vld [vmem:[%s1065_s1 + $0xa0] sm:$0xff] }
   0xe   :  { %657 = vmatprep.subr.mxu1 %v75_v21  ;;  %623 = vmatpush3.msra.mxu0 %v27_v22  ;;  %v71_v37 = vld [vmem:[%s1065_s1 + $0x1b0] sm:$0xff]  ;;  %v70_v41 = vld [vmem:[%s1065_s1 + $0x1a8] sm:$0xff]  ;;  %v69_v45 = vld [vmem:[%s1065_s1 + $0x1a0] sm:$0xff] }
   0xf   :  { %658 = vmatpush3.msra.mxu1 %v59_v23  ;;  %624 = vmatprep.subr.mxu0 %v42_v24  ;;  %v23_v38 = vld [vmem:[%s1065_s1 + $0x30] sm:$0xff]  ;;  %v22_v42 = vld [vmem:[%s1065_s1 + $0x28] sm:$0xff]  ;;  %v21_v46 = vld [vmem:[%s1065_s1 + $0x20] sm:$0xff] }
  0x10   :  { %659 = vmatprep.subr.mxu1 %v74_v25  ;;  %625 = vmatpush3.msra.mxu0 %v26_v26  ;;  %v55_v39 = vld [vmem:[%s1065_s1 + $0x130] sm:$0xff]  ;;  %v54_v43 = vld [vmem:[%s1065_s1 + $0x128] sm:$0xff]  ;;  %v53_v47 = vld [vmem:[%s1065_s1 + $0x120] sm:$0xff] }
  0x11   :  { %660 = vmatpush3.msra.mxu1 %v58_v27  ;;  %626 = vmatprep.subr.mxu0 %v41_v28  ;;  %v36_v48 = vld [vmem:[%s1065_s1 + $0x98] sm:$0xff]  ;;  %v35_v52 = vld [vmem:[%s1065_s1 + $0x90] sm:$0xff]  ;;  %v34_v56 = vld [vmem:[%s1065_s1 + $0x88] sm:$0xff] }
  0x12   :  { %661 = vmatprep.subr.mxu1 %v73_v29  ;;  %627 = vmatpush3.msra.mxu0 %v25_v30  ;;  %v68_v49 = vld [vmem:[%s1065_s1 + $0x198] sm:$0xff]  ;;  %v67_v53 = vld [vmem:[%s1065_s1 + $0x190] sm:$0xff]  ;;  %v66_v57 = vld [vmem:[%s1065_s1 + $0x188] sm:$0xff] }
  0x13   :  { %662 = vmatpush3.msra.mxu1 %v57_v31  ;;  %628 = vmatprep.subr.mxu0 %v40_v32  ;;  %v20_v50 = vld [vmem:[%s1065_s1 + $0x18] sm:$0xff]  ;;  %v19_v54 = vld [vmem:[%s1065_s1 + $0x10] sm:$0xff]  ;;  %v18_v58 = vld [vmem:[%s1065_s1 + $0x8] sm:$0xff] }
  0x14   :  { %663 = vmatprep.subr.mxu1 %v72_v33  ;;  %629 = vmatpush3.msra.mxu0 %v24_v34  ;;  %v52_v51 = vld [vmem:[%s1065_s1 + $0x118] sm:$0xff]  ;;  %v51_v55 = vld [vmem:[%s1065_s1 + $0x110] sm:$0xff]  ;;  %v50_v59 = vld [vmem:[%s1065_s1 + $0x108] sm:$0xff] }
  0x15   :  { %664 = vmatpush3.msra.mxu1 %v56_v35  ;;  %630 = vmatprep.subr.mxu0 %v39_v36  ;;  %v33_v60 = vld [vmem:[%s1065_s1 + $0x80] sm:$0xff]  ;;  %v91_v63 = vld [vmem:[%s1066_s0 + $0x8] sm:$0xff]  ;;  %v93_v1 = vld [vmem:[%s1066_s0 + $0x18] sm:$0xff] }
  0x16   :  { %665 = vmatprep.subr.mxu1 %v71_v37  ;;  %631 = vmatpush3.msra.mxu0 %v23_v38  ;;  %v65_v61 = vld [vmem:[%s1065_s1 + $0x180] sm:$0xff]  ;;  %v92_v3 = vld [vmem:[%s1066_s0 + $0x10] sm:$0xff]  ;;  %v83_v29 = vld [vmem:[%s1068_s3 + $0x8] sm:$0xff] }
  0x17   :  { %666 = vmatpush3.msra.mxu1 %v55_v39  ;;  %632 = vmatprep.subr.mxu0 %v38_v40  ;;  %v17_v62 = vld [vmem:[%s1065_s1] sm:$0xff]  ;;  %v85_v35 = vld [vmem:[%s1068_s3 + $0x18] sm:$0xff]  ;;  %v84_v37 = vld [vmem:[%s1068_s3 + $0x10] sm:$0xff] }
  0x18   :  { %667 = vmatprep.subr.mxu1 %v70_v41  ;;  %633 = vmatpush3.msra.mxu0 %v22_v42  ;;  %v49_v0 = vld [vmem:[%s1065_s1 + $0x100] sm:$0xff]  ;;  %v87_v41 = vld [vmem:[%s1068_s3 + $0x28] sm:$0xff] }
  0x19   :  { %668 = vmatpush3.msra.mxu1 %v54_v43  ;;  %634 = vmatprep.subr.mxu0 %v37_v44  ;;  %v90_v2 = vld [vmem:[%s1066_s0] sm:$0xff] }
  0x1a   :  { %669 = vmatprep.subr.mxu1 %v69_v45  ;;  %635 = vmatpush3.msra.mxu0 %v21_v46  ;;  %v81_v11 = vld [vmem:[%s1067_s2] sm:$0xf] }
  0x1b   :  { %670 = vmatpush3.msra.mxu1 %v53_v47  ;;  %636 = vmatprep.subr.mxu0 %v36_v48  ;;  %v82_v31 = vld [vmem:[%s1068_s3] sm:$0xff]  ;;  %v89_v47 = vld [vmem:[%s1068_s3 + $0x38] sm:$0xff] }
  0x1c   :  { %671 = vmatprep.subr.mxu1 %v68_v49  ;;  %637 = vmatpush3.msra.mxu0 %v20_v50  ;;  %v86_v43 = vld [vmem:[%s1068_s3 + $0x20] sm:$0xff]  ;;  %v88_v49 = vld [vmem:[%s1068_s3 + $0x30] sm:$0xff] }
  0x1d   :  { %672 = vmatpush3.msra.mxu1 %v52_v51  ;;  %638 = vmatprep.subr.mxu0 %v35_v52 }
  0x1e   :  { %673 = vmatprep.subr.mxu1 %v67_v53  ;;  %639 = vmatpush3.msra.mxu0 %v19_v54 }
  0x1f   :  { %674 = vmatpush3.msra.mxu1 %v51_v55  ;;  %640 = vmatprep.subr.mxu0 %v34_v56 }
  0x20   :  { %675 = vmatprep.subr.mxu1 %v66_v57  ;;  %641 = vmatpush3.msra.mxu0 %v18_v58 }
  0x21   :  { %676 = vmatpush3.msra.mxu1 %v50_v59  ;;  %642 = vmatprep.subr.mxu0 %v33_v60 }
  0x22   :  { %677 = vmatprep.subr.mxu1 %v65_v61  ;;  %643 = vmatpush3.msra.mxu0 %v17_v62 }
  0x23   :  { %158 = vmatprep.mubr.f32.mxu0 %v91_v63  ;;  %678 = vmatpush3.msra.mxu1 %v49_v0 }
  0x24   :  { %228 = vmatprep.mubr.f32.mxu1 %v93_v1  ;;  %159 = vmatmul.mubr.f32.vlgmr.msra.gmra.mxu0 %v90_v2 }
  0x25   :  { %229 = vmatmul.mubr.f32.vlgmr.msra.gmra.mxu1 %v92_v3  ;;  %700 = vmatprep.subr.msk.mxu0 %vm291_vm0, %v81_v11 }
  0x26   :  { %714 = vmatprep.subr.msk.mxu1 %vm291_vm0, %v81_v11  ;;  %701 = vmatpush3.msk.msra.mxu0 %vm291_vm0, %v81_v11 }
  0x27   :  { %715 = vmatpush3.msk.msra.mxu1 %vm291_vm0, %v81_v11 }
  0xe4   :  { %v644_v4 = vpop.f32.mrf.mxu0 }
  0xe5   :  { %v679_v5 = vpop.f32.mrf.mxu1 }
  0xe6   :  { %v645_v6 = vpop.f32.mrf.mxu0 }
  0xe7   :  { %v680_v7 = vpop.f32.mrf.mxu1  ;;  %v646_v8 = vadd.f32 %v645_v6, %v644_v4 }
  0xe8   :  { %v681_v9 = vadd.f32 %v680_v7, %v679_v5 }
  0xea   :  { %v231_v10 = vadd.f32 %v681_v9, %v646_v8 }
  0xec   :  { %234 = vxpose.xlu0.b32.start.end [1/1] (short) (narrow) %v231_v10, 64  ;;  %v410_v12 = vrot.slane %v231_v10, 4 }
 0x109   :  { %412 = vxpose.xlu0.b32.start.end [1/1] (short) (narrow) %v410_v12, 64 }
 0x168   :  { %v250_v13 = vpop.trf.xlu0 }
 0x169   :  { %702 = vmatprep.mubr.msk.f32.mxu0 %vm266_vm1, %v250_v13 }
 0x16c   :  { %v251_v14 = vpop.trf.xlu0 }
 0x16d   :  { %703 = vmatmul.mubr.msk.f32.vlgmr.msra.gmra.mxu0 %vm266_vm1, %v251_v14 }
 0x170   :  { %v252_v15 = vpop.trf.xlu0 }
 0x171   :  { %705 = vmatprep.mubr.msk.f32.mxu0 %vm266_vm1, %v252_v15 }
 0x174   :  { %v253_v16 = vpop.trf.xlu0 }
 0x175   :  { %706 = vmatmul.mubr.msk.f32.gmra.mxu0 %vm266_vm1, %v253_v16 }
 0x178   :  { %v254_v17 = vpop.trf.xlu0 }
 0x179   :  { %708 = vmatprep.mubr.msk.f32.mxu0 %vm266_vm1, %v254_v17 }
 0x17c   :  { %v255_v18 = vpop.trf.xlu0 }
 0x17d   :  { %709 = vmatmul.mubr.msk.f32.gmra.mxu0 %vm266_vm1, %v255_v18 }
 0x180   :  { %v256_v19 = vpop.trf.xlu0 }
 0x181   :  { %711 = vmatprep.mubr.msk.f32.mxu0 %vm266_vm1, %v256_v19 }
 0x184   :  { %v257_v20 = vpop.trf.xlu0 }
 0x185   :  { %712 = vmatmul.mubr.msk.f32.gmra.mxu0 %vm266_vm1, %v257_v20 }
 0x188   :  { %v428_v21 = vpop.trf.xlu0 }
 0x189   :  { %716 = vmatprep.mubr.msk.f32.mxu1 %vm266_vm1, %v428_v21 }
 0x18c   :  { %v429_v22 = vpop.trf.xlu0 }
 0x18d   :  { %717 = vmatmul.mubr.msk.f32.vlgmr.msra.gmra.mxu1 %vm266_vm1, %v429_v22 }
 0x190   :  { %v430_v23 = vpop.trf.xlu0 }
 0x191   :  { %719 = vmatprep.mubr.msk.f32.mxu1 %vm266_vm1, %v430_v23 }
 0x194   :  { %v431_v24 = vpop.trf.xlu0 }
 0x195   :  { %720 = vmatmul.mubr.msk.f32.gmra.mxu1 %vm266_vm1, %v431_v24 }
 0x198   :  { %v432_v25 = vpop.trf.xlu0 }
 0x199   :  { %722 = vmatprep.mubr.msk.f32.mxu1 %vm266_vm1, %v432_v25 }
 0x19c   :  { %v433_v26 = vpop.trf.xlu0 }
 0x19d   :  { %723 = vmatmul.mubr.msk.f32.gmra.mxu1 %vm266_vm1, %v433_v26 }
 0x1a0   :  { %v434_v27 = vpop.trf.xlu0 }
 0x1a1   :  { %725 = vmatprep.mubr.msk.f32.mxu1 %vm266_vm1, %v434_v27 }
 0x1a4   :  { %v435_v28 = vpop.trf.xlu0 }
 0x1a5   :  { %726 = vmatmul.mubr.msk.f32.gmra.mxu1 %vm266_vm1, %v435_v28 }
 0x22d   :  { %v704_v30 = vpop.f32.mrf.mxu0 }
 0x22e   :  { %v367_v32 = vadd.f32 %v704_v30, %v83_v29 }
 0x22f   :  { %v361_v33 = vpop.f32.mrf.mxu0 }
 0x230   :  { %402 = vst.msk [vmem:[%s1069_s4 + $0x8] sm:$0xff] %vm400_vm2, %v367_v32  ;;  %v362_v34 = vadd.f32 %v361_v33, %v82_v31 }
 0x232   :  { %401 = vst.msk [vmem:[%s1069_s4] sm:$0xff] %vm400_vm2, %v362_v34 }
 0x235   :  { %v707_v36 = vpop.f32.mrf.mxu0 }
 0x236   :  { %v377_v38 = vadd.f32 %v707_v36, %v85_v35 }
 0x237   :  { %v371_v39 = vpop.f32.mrf.mxu0 }
 0x238   :  { %404 = vst.msk [vmem:[%s1069_s4 + $0x18] sm:$0xff] %vm400_vm2, %v377_v38  ;;  %v372_v40 = vadd.f32 %v371_v39, %v84_v37 }
 0x23a   :  { %403 = vst.msk [vmem:[%s1069_s4 + $0x10] sm:$0xff] %vm400_vm2, %v372_v40 }
 0x23d   :  { %v710_v42 = vpop.f32.mrf.mxu0 }
 0x23e   :  { %v387_v44 = vadd.f32 %v710_v42, %v87_v41 }
 0x23f   :  { %v381_v45 = vpop.f32.mrf.mxu0 }
 0x240   :  { %406 = vst.msk [vmem:[%s1069_s4 + $0x28] sm:$0xff] %vm400_vm2, %v387_v44  ;;  %v382_v46 = vadd.f32 %v381_v45, %v86_v43 }
 0x242   :  { %405 = vst.msk [vmem:[%s1069_s4 + $0x20] sm:$0xff] %vm400_vm2, %v382_v46 }
 0x245   :  { %v713_v48 = vpop.f32.mrf.mxu0 }
 0x246   :  { %v397_v50 = vadd.f32 %v713_v48, %v89_v47 }
 0x247   :  { %v391_v51 = vpop.f32.mrf.mxu0 }
 0x248   :  { %408 = vst.msk [vmem:[%s1069_s4 + $0x38] sm:$0xff] %vm400_vm2, %v397_v50  ;;  %v392_v52 = vadd.f32 %v391_v51, %v88_v49 }
 0x24a   :  { %407 = vst.msk [vmem:[%s1069_s4 + $0x30] sm:$0xff] %vm400_vm2, %v392_v52 }
 0x24d   :  { %v718_v53 = vpop.f32.mrf.mxu1 }
 0x24e   :  { %v540_v54 = vadd.f32 %v718_v53, %v83_v29 }
 0x24f   :  { %v534_v55 = vpop.f32.mrf.mxu1 }
 0x250   :  { %605 = vst.msk [vmem:[%s1069_s4 + $0x48] sm:$0xff] %vm400_vm2, %v540_v54  ;;  %v535_v56 = vadd.f32 %v534_v55, %v82_v31 }
 0x252   :  { %604 = vst.msk [vmem:[%s1069_s4 + $0x40] sm:$0xff] %vm400_vm2, %v535_v56 }
 0x255   :  { %v721_v57 = vpop.f32.mrf.mxu1 }
 0x256   :  { %v550_v58 = vadd.f32 %v721_v57, %v85_v35 }
 0x257   :  { %v544_v59 = vpop.f32.mrf.mxu1 }
 0x258   :  { %607 = vst.msk [vmem:[%s1069_s4 + $0x58] sm:$0xff] %vm400_vm2, %v550_v58  ;;  %v545_v60 = vadd.f32 %v544_v59, %v84_v37 }
 0x25a   :  { %606 = vst.msk [vmem:[%s1069_s4 + $0x50] sm:$0xff] %vm400_vm2, %v545_v60 }
 0x25d   :  { %v724_v61 = vpop.f32.mrf.mxu1 }
 0x25e   :  { %v560_v62 = vadd.f32 %v724_v61, %v87_v41 }
 0x25f   :  { %v554_v63 = vpop.f32.mrf.mxu1 }
 0x260   :  { %609 = vst.msk [vmem:[%s1069_s4 + $0x68] sm:$0xff] %vm400_vm2, %v560_v62  ;;  %v555_v0 = vadd.f32 %v554_v63, %v86_v43 }
 0x262   :  { %608 = vst.msk [vmem:[%s1069_s4 + $0x60] sm:$0xff] %vm400_vm2, %v555_v0 }
 0x265   :  { %v727_v1 = vpop.f32.mrf.mxu1 }
 0x266   :  { %v570_v2 = vadd.f32 %v727_v1, %v89_v47 }
 0x267   :  { %v564_v3 = vpop.f32.mrf.mxu1 }
 0x268   :  { %611 = vst.msk [vmem:[%s1069_s4 + $0x78] sm:$0xff] %vm400_vm2, %v570_v2  ;;  %v565_v4 = vadd.f32 %v564_v3, %v88_v49 }
 0x26a   :  { %610 = vst.msk [vmem:[%s1069_s4 + $0x70] sm:$0xff] %vm400_vm2, %v565_v4 }

</bundles_post_ra>
